<compile_context>
chip_gen: v7x
topology: tpu7x:2x2x1
jax: 0.10.0
libtpu: 0.0.40
codegen_flags: <defaults>
</compile_context>

<pallas_src>
import functools

import jax
import jax.numpy as jnp
from jax import lax
from jax.experimental import pallas as pl
from jax.experimental.pallas import tpu as pltpu

EPS = 1e-5                      # nn.BatchNorm2d default eps
_LANE = 128


def _round_up(x, m):
    return (x + m - 1) // m * m


def _largest_divisor_leq(n, cap):
    for d in range(min(n, cap), 0, -1):
        if n % d == 0:
            return d
    return 1


def _row_tile(m):
    for t in (512, 256, 128, 64, 32, 16, 8):
        if m % t == 0:
            return t
    return 8


@functools.lru_cache(maxsize=None)
def _vmem_limit():
    """Generation-aware scoped-VMEM limit (v5e/v6e: 128 MiB phys, v7x: 64)."""
    try:
        cap = int(pltpu.get_tpu_info().vmem_capacity_bytes)
    except Exception:
        return 32 * 1024 * 1024
    if cap >= 100 * 1024 * 1024:
        return 96 * 1024 * 1024
    return 40 * 1024 * 1024


# --------------------------------------------------------------------------- #
# Kernel 1: tiled GEMM with K-reduction grid + fused BN-stat epilogue
# --------------------------------------------------------------------------- #

def _matmul_stats_kernel(a_ref, b_ref, y_ref, st_ref, acc_ref):
    k = pl.program_id(2)

    @pl.when(k == 0)
    def _():
        acc_ref[...] = jnp.zeros_like(acc_ref)

    acc_ref[...] += jnp.dot(a_ref[...], b_ref[...],
                            preferred_element_type=jnp.float32)

    @pl.when(k == pl.num_programs(2) - 1)
    def _():
        acc = acc_ref[...]
        y_ref[...] = acc.astype(y_ref.dtype)          # bf16 HBM intermediate
        # Direct row stores (no sublane concat in the hot finalize path).
        st_ref[0, 0:1, :] = jnp.sum(acc, axis=0, keepdims=True)
        st_ref[0, 1:2, :] = jnp.sum(acc * acc, axis=0, keepdims=True)


def _tiled_matmul_stats(a, b):
    """a:(M,K), b:(K,N) with N a multiple of 128.  bf16 MXU inputs, f32 acc.
    Returns y:(M,N) bf16 and per-channel (sum, sumsq) over the M rows."""
    M, K = a.shape
    _, Np = b.shape
    # K: pad only to the next lane multiple; split into <=512 tiles.
    Kp = _round_up(K, _LANE)
    if Kp <= 640:
        tk = Kp
    else:
        tk = next(t for t in (512, 384, 256, 128) if Kp % t == 0)
    # M: bf16 packs 16 rows per sublane group.
    if M >= 1024:
        tm = 512
    elif M >= 256:
        tm = 256
    else:
        tm = _round_up(M, 16)
    Mp = _round_up(M, tm)
    tn = 256 if Np % 256 == 0 else _LANE
    a = jnp.pad(a, ((0, Mp - M), (0, Kp - K))).astype(jnp.bfloat16)
    b = jnp.pad(b, ((0, Kp - K), (0, 0))).astype(jnp.bfloat16)
    gm, gn, gk = Mp // tm, Np // tn, Kp // tk
    y, st = pl.pallas_call(
        _matmul_stats_kernel,
        out_shape=(jax.ShapeDtypeStruct((Mp, Np), jnp.bfloat16),
                   jax.ShapeDtypeStruct((gm, 2, Np), jnp.float32)),
        grid=(gm, gn, gk),
        in_specs=[pl.BlockSpec((tm, tk), lambda i, j, k: (i, k)),
                  pl.BlockSpec((tk, tn), lambda i, j, k: (k, j))],
        out_specs=(pl.BlockSpec((tm, tn), lambda i, j, k: (i, j)),
                   pl.BlockSpec((1, 2, tn), lambda i, j, k: (i, 0, j))),
        scratch_shapes=[pltpu.VMEM((tm, tn), jnp.float32)],
        compiler_params=pltpu.CompilerParams(
            dimension_semantics=("parallel", "parallel", "arbitrary"),
            vmem_limit_bytes=_vmem_limit()),
    )(a, b)
    return y[:M], jnp.sum(st, axis=0)


# --------------------------------------------------------------------------- #
# Kernel 2: direct 3x3 stride-1 conv, row-tiled, kw-packed K, optional fused
#           input BN+ReLU, dense output, fused BN-stat partials
# --------------------------------------------------------------------------- #

def _conv3x3_kernel(x_ref, w_ref, s_ref, b_ref, y_ref, st_ref,
                    *, th, H, W, fuse_input_bn):
    # x_ref: (1, H+2, Wp, Cin) zero-padded image (bf16), full image per n
    # w_ref: (3, 3*Cin, tco) bf16 ;  y_ref: (1, th, W, tco) bf16 (dense)
    # st_ref: (1, 1, 2, tco) f32 partial stats for this (n, ht) tile
    ht = pl.program_id(2)
    r0 = pl.multiple_of(ht * th, th)
    xin = x_ref[0, pl.ds(r0, th + 2), :, :]            # (th+2, Wp, Cin)

    if fuse_input_bn:
        # Apply previous-layer BN + ReLU in VMEM; mask the zero-pad border so
        # it stays exactly zero (BN shift would otherwise leak into padding).
        s = s_ref[...].reshape(1, 1, -1)
        b = b_ref[...].reshape(1, 1, -1)
        xf = xin.astype(jnp.float32) * s + b
        rows = lax.broadcasted_iota(jnp.int32, xf.shape, 0) + r0
        cols = lax.broadcasted_iota(jnp.int32, xf.shape, 1)
        interior = (rows >= 1) & (rows <= H) & (cols >= 1) & (cols <= W)
        xin = jnp.where(interior, jnp.maximum(xf, 0.0), 0.0).astype(jnp.bfloat16)

    # kw-im2col: K = 3*Cin per MXU dot, three dots total (one per kh tap),
    # accumulated as values (no per-tap accumulator read-modify-write).
    x3 = jnp.concatenate([xin[:, j:j + W, :] for j in range(3)], axis=-1)
    x3 = x3.reshape((th + 2) * W, -1)
    acc = None
    for i in range(3):
        lhs = x3[i * W:(i + th) * W]                   # sublane-aligned (W%8==0 typ.)
        d = jnp.dot(lhs, w_ref[i], preferred_element_type=jnp.float32)
        acc = d if acc is None else acc + d

    y_ref[0] = acc.reshape(th, W, -1).astype(y_ref.dtype)     # bf16, dense
    st_ref[0, 0, 0:1, :] = jnp.sum(acc, axis=0, keepdims=True)
    st_ref[0, 0, 1:2, :] = jnp.sum(acc * acc, axis=0, keepdims=True)


def _conv3x3(x_nhwc, w_hwio, cout_p, *, in_scale=None, in_shift=None):
    """3x3, stride 1, pad 1 conv.  Optionally fuses a per-channel
    scale/shift + ReLU (previous BN) onto the *input* inside the kernel.
    Returns dense y:(N,H,W,cout_p) bf16 and per-channel (sum, sumsq) stats."""
    N, H, W, Cin = x_nhwc.shape
    Wp = _round_up(W + 2, 8)                           # 8-aligned sublane stride
    xp = jnp.pad(x_nhwc,
                 ((0, 0), (1, 1), (1, Wp - W - 1), (0, 0))).astype(jnp.bfloat16)
    wp = jnp.pad(w_hwio, ((0, 0), (0, 0), (0, 0), (0, cout_p - w_hwio.shape[-1])))
    wf = wp.reshape(3, 3 * Cin, cout_p).astype(jnp.bfloat16)

    fuse = in_scale is not None
    if not fuse:
        in_scale = jnp.ones((1, Cin), jnp.float32)
        in_shift = jnp.zeros((1, Cin), jnp.float32)

    tco = 256 if cout_p % 256 == 0 else _LANE
    th = _largest_divisor_leq(H, 8)                    # row tile (divides H)
    HT, CT = H // th, cout_p // tco

    y, st = pl.pallas_call(
        functools.partial(_conv3x3_kernel, th=th, H=H, W=W, fuse_input_bn=fuse),
        out_shape=(jax.ShapeDtypeStruct((N, H, W, cout_p), jnp.bfloat16),
                   jax.ShapeDtypeStruct((N, HT, 2, cout_p), jnp.float32)),
        grid=(N, CT, HT),
        in_specs=[pl.BlockSpec((1, H + 2, Wp, Cin), lambda n, c, h: (n, 0, 0, 0)),
                  pl.BlockSpec((3, 3 * Cin, tco), lambda n, c, h: (0, 0, c)),
                  pl.BlockSpec((1, Cin), lambda n, c, h: (0, 0)),
                  pl.BlockSpec((1, Cin), lambda n, c, h: (0, 0))],
        out_specs=(pl.BlockSpec((1, th, W, tco), lambda n, c, h: (n, h, 0, c)),
                   pl.BlockSpec((1, 1, 2, tco), lambda n, c, h: (n, h, 0, c))),
        compiler_params=pltpu.CompilerParams(
            dimension_semantics=("parallel", "parallel", "parallel"),
            vmem_limit_bytes=_vmem_limit()),
    )(xp, wf, in_scale, in_shift)
    return y, jnp.sum(st, axis=(0, 1))


# --------------------------------------------------------------------------- #
# Kernel 3: fused bn2 + (shortcut BN) + residual add + ReLU  [+ preact]
# --------------------------------------------------------------------------- #

def _residual_out_kernel(y_ref, sc_ref, s2_ref, b2_ref, ss_ref, bs_ref,
                         *out_refs, emit_preact, cpad):
    sc = sc_ref[...].astype(jnp.float32) * ss_ref[...] + bs_ref[...]
    if cpad:
        # Zero-extend the identity shortcut to cp lanes inside the kernel
        # (no XLA-side channel pad of the big tensor).
        sc = jnp.concatenate(
            [sc, jnp.zeros((sc.shape[0], cpad), jnp.float32)], axis=-1)
    pre = y_ref[...].astype(jnp.float32) * s2_ref[...] + b2_ref[...] + sc
    out_refs[0][...] = jnp.maximum(pre, 0.0)
    if emit_preact:
        out_refs[1][...] = pre


def _residual_out(y, shortcut, scale2, shift2, scale_sc, shift_sc,
                  *, emit_preact, cpad):
    M, C = y.shape
    Csc = shortcut.shape[1]
    tm = _row_tile(M)
    Mp = _round_up(M, tm)
    if Mp != M:                                        # rare tail case only
        y = jnp.pad(y, ((0, Mp - M), (0, 0)))
        shortcut = jnp.pad(shortcut, ((0, Mp - M), (0, 0)))
    row_y = pl.BlockSpec((tm, C), lambda i: (i, 0))
    row_s = pl.BlockSpec((tm, Csc), lambda i: (i, 0))
    vec_y = pl.BlockSpec((1, C), lambda i: (0, 0))
    vec_s = pl.BlockSpec((1, Csc), lambda i: (0, 0))
    if emit_preact:
        out_shape = (jax.ShapeDtypeStruct((Mp, C), jnp.float32),
                     jax.ShapeDtypeStruct((Mp, C), jnp.float32))
        out_specs = (row_y, row_y)
    else:
        out_shape = jax.ShapeDtypeStruct((Mp, C), jnp.float32)
        out_specs = row_y
    res = pl.pallas_call(
        functools.partial(_residual_out_kernel, emit_preact=emit_preact, cpad=cpad),
        out_shape=out_shape,
        grid=(Mp // tm,),
        in_specs=[row_y, row_s, vec_y, vec_y, vec_s, vec_s],
        out_specs=out_specs,
        compiler_params=pltpu.CompilerParams(
            dimension_semantics=("parallel",),
            vmem_limit_bytes=_vmem_limit()),
    )(y, shortcut, scale2, shift2, scale_sc, shift_sc)
    if emit_preact:
        return res[0][:M], res[1][:M]
    return res[:M], None


# ------------------------------ JAX-side glue ------------------------------ #

def _bn_scale_shift(stats, count, gamma, beta, cp):
    """Finalize training-mode BN from (sum, sumsq) partials (tiny arrays)."""
    mean = stats[0] / count
    var = jnp.maximum(stats[1] / count - mean * mean, 0.0)
    inv = lax.rsqrt(var + EPS)
    g = jnp.pad(gamma, (0, cp - gamma.shape[0]))
    b = jnp.pad(beta, (0, cp - beta.shape[0]))
    scale = (g * inv).astype(jnp.float32)
    shift = (b - mean * scale).astype(jnp.float32)
    return scale.reshape(1, cp), shift.reshape(1, cp)


def _im2col(x, kh, kw, stride, pad):
    N, H, W, C = x.shape
    xp = jnp.pad(x, ((0, 0), (pad, pad), (pad, pad), (0, 0)))
    Ho = (H + 2 * pad - kh) // stride + 1
    Wo = (W + 2 * pad - kw) // stride + 1
    cols = [xp[:, i:i + stride * Ho:stride, j:j + stride * Wo:stride, :]
            for i in range(kh) for j in range(kw)]
    patches = jnp.concatenate(cols, axis=-1)
    return patches.reshape(N * Ho * Wo, kh * kw * C), Ho, Wo


def init_params(key, in_planes, planes, stride):
    """Deterministic synthetic parameters. Conv weights stored HWIO."""
    ks = jax.random.split(key, 9)
    p = {
        "w1": 0.1 * jax.random.normal(ks[0], (3, 3, in_planes, planes), jnp.float32),
        "g1": 1.0 + 0.1 * jax.random.normal(ks[1], (planes,), jnp.float32),
        "b1": 0.1 * jax.random.normal(ks[2], (planes,), jnp.float32),
        "w2": 0.1 * jax.random.normal(ks[3], (3, 3, planes, planes), jnp.float32),
        "g2": 1.0 + 0.1 * jax.random.normal(ks[4], (planes,), jnp.float32),
        "b2": 0.1 * jax.random.normal(ks[5], (planes,), jnp.float32),
    }
    if stride != 1 or in_planes != planes:
        p["wsc"] = 0.1 * jax.random.normal(ks[6], (1, 1, in_planes, planes), jnp.float32)
        p["gsc"] = 1.0 + 0.05 * jax.random.normal(ks[7], (planes,), jnp.float32)
        p["bsc"] = 0.05 * jax.random.normal(ks[8], (planes,), jnp.float32)
    return p


def basic_block_forward(x_nchw, params, stride=1, is_last=False):
    """Matches BasicBlock.forward (PyTorch NCHW in / NCHW out, train-mode BN)."""
    x = jnp.transpose(x_nchw, (0, 2, 3, 1)).astype(jnp.float32)   # NHWC
    N, H, W, Cin = x.shape
    planes = params["w1"].shape[-1]
    cp = _round_up(planes, _LANE)                                 # lane-dense Cout
    Ho = (H - 1) // stride + 1
    Wo = (W - 1) // stride + 1
    M = N * Ho * Wo
    count = float(M)

    # ---- conv1 (3x3, stride, pad=1) with fused bn1 statistics ----
    if stride == 1:
        y1, st1 = _conv3x3(x, params["w1"], cp)                   # (N,H,W,cp) bf16
    else:
        # TODO(synk): strided conv1 still materializes im2col patches in HBM;
        # a streaming strided direct conv would remove this read amplification.
        p1, Ho, Wo = _im2col(x, 3, 3, stride, 1)
        w1 = jnp.pad(params["w1"].reshape(9 * Cin, planes),
                     ((0, 0), (0, cp - planes)))
        y1, st1 = _tiled_matmul_stats(p1, w1)                     # (M,cp) bf16
        y1 = y1.reshape(N, Ho, Wo, cp)
    s1, b1 = _bn_scale_shift(st1, count, params["g1"], params["b1"], cp)

    # ---- conv2 (3x3, stride 1, pad 1): BN1+ReLU fused on its input path ----
    w2 = jnp.pad(params["w2"], ((0, 0), (0, 0), (0, cp - planes), (0, 0)))
    y2, st2 = _conv3x3(y1, w2, cp, in_scale=s1, in_shift=b1)      # (N,Ho,Wo,cp)
    s2, b2 = _bn_scale_shift(st2, count, params["g2"], params["b2"], cp)

    # ---- shortcut branch (projection GEMM+stats or identity pass-through) ----
    if "wsc" in params:
        xs = x[:, ::stride, ::stride, :].reshape(M, Cin)
        wsc = jnp.pad(params["wsc"].reshape(Cin, planes), ((0, 0), (0, cp - planes)))
        shortcut, stsc = _tiled_matmul_stats(xs, wsc)             # (M,cp) bf16
        ssc, bsc = _bn_scale_shift(stsc, count, params["gsc"], params["bsc"], cp)
        cpad = 0
    else:  # identity: stride == 1 and in_planes == planes
        shortcut = x.reshape(M, Cin)                              # f32 view, no copy
        ssc = jnp.ones((1, Cin), jnp.float32)
        bsc = jnp.zeros((1, Cin), jnp.float32)
        cpad = cp - Cin

    # ---- fused bn2 + shortcut-BN + residual add + ReLU (preact only if last) ----
    out_flat, pre_flat = _residual_out(y2.reshape(M, cp), shortcut,
                                       s2, b2, ssc, bsc,
                                       emit_preact=is_last, cpad=cpad)
    # NOTE: when blocks are stacked, keep activations NHWC with cp-padded
    # channels and skip this slice/transpose until the network boundary.
    out = jnp.transpose(out_flat.reshape(N, Ho, Wo, cp)[..., :planes], (0, 3, 1, 2))
    if is_last:
        pre = jnp.transpose(pre_flat.reshape(N, Ho, Wo, cp)[..., :planes], (0, 3, 1, 2))
        return out, pre
    return out


# ------------------------- pure-JAX reference check ------------------------ #

def reference_forward(x_nchw, params, stride, is_last):
    x = jnp.transpose(x_nchw, (0, 2, 3, 1)).astype(jnp.float32)

    def conv(inp, w, s, pad):
        return jax.lax.conv_general_dilated(
            inp, w, (s, s), [(pad, pad), (pad, pad)],
            dimension_numbers=("NHWC", "HWIO", "NHWC"),
            precision=jax.lax.Precision.HIGHEST)

    def bn(y, g, b):
        mean = jnp.mean(y, axis=(0, 1, 2), keepdims=True)
        var = jnp.mean(jnp.square(y - mean), axis=(0, 1, 2), keepdims=True)
        return (y - mean) * jax.lax.rsqrt(var + EPS) * g + b

    o = jax.nn.relu(bn(conv(x, params["w1"], stride, 1), params["g1"], params["b1"]))
    o = bn(conv(o, params["w2"], 1, 1), params["g2"], params["b2"])
    s = bn(conv(x, params["wsc"], stride, 0), params["gsc"], params["bsc"]) if "wsc" in params else x
    pre = o + s
    out = jax.nn.relu(pre)
    out = jnp.transpose(out, (0, 3, 1, 2))
    pre = jnp.transpose(pre, (0, 3, 1, 2))
    return (out, pre) if is_last else out


if __name__ == "__main__":
    key = jax.random.PRNGKey(0)
    k1, k2, k3, k4 = jax.random.split(key, 4)
    TOL = dict(atol=1e-1, rtol=5e-2)   # bf16 MXU + bf16 HBM intermediates vs f32 ref

    # Case 1: projection shortcut (stride=2, channel expansion), is_last=True.
    in_planes, planes, stride = 4, 8, 2
    x = jax.random.normal(k1, (2, in_planes, 16, 16), jnp.float32)   # NCHW
    params = init_params(k2, in_planes, planes, stride)
    out, pre = basic_block_forward(x, params, stride=stride, is_last=True)
    jax.block_until_ready((out, pre))
    ref_out, ref_pre = reference_forward(x, params, stride, True)
    assert out.shape == (2, planes, 8, 8) and pre.shape == (2, planes, 8, 8)
    assert jnp.allclose(out, ref_out, **TOL), float(jnp.max(jnp.abs(out - ref_out)))
    assert jnp.allclose(pre, ref_pre, **TOL), float(jnp.max(jnp.abs(pre - ref_pre)))

    # Case 2: identity shortcut (stride=1, same channels), is_last=False.
    # H=16 with row-tile th=8 exercises the multi-row-tile (ht>0) path.
    x2 = jax.random.normal(k3, (2, 8, 16, 16), jnp.float32)
    params2 = init_params(k4, 8, 8, 1)
    out2 = basic_block_forward(x2, params2, stride=1, is_last=False)
    jax.block_until_ready(out2)
    ref_out2 = reference_forward(x2, params2, 1, False)
    assert out2.shape == (2, 8, 16, 16)
    assert jnp.allclose(out2, ref_out2, **TOL), float(jnp.max(jnp.abs(out2 - ref_out2)))

    print("KERNEL_OK")
</pallas_src>

<mosaic_0001>
module attributes {stable_mosaic.version = 11 : i64} {
  func.func @_matmul_stats_kernel(%arg0: i32, %arg1: i32, %arg2: i32, %arg3: memref<128x128xbf16, #tpu.memory_space<vmem>>, %arg4: memref<128x128xbf16, #tpu.memory_space<vmem>>, %arg5: memref<128x128xbf16, #tpu.memory_space<vmem>>, %arg6: memref<1x2x128xf32, #tpu.memory_space<vmem>>, %arg7: memref<128x128xf32, #tpu.memory_space<vmem>>) attributes {dimension_semantics = [#tpu.dimension_semantics<parallel>, #tpu.dimension_semantics<parallel>, #tpu.dimension_semantics<arbitrary>], iteration_bounds = array<i64: 1, 1, 1>, scalar_prefetch = 0 : i64, scratch_operands = 1 : i64, tpu.core_type = #tpu.core_type<tc>, window_params = [{transform_indices = @transform_0, window_bounds = array<i64: 128, 128>}, {transform_indices = @transform_1, window_bounds = array<i64: 128, 128>}, {transform_indices = @transform_2, window_bounds = array<i64: 128, 128>}, {transform_indices = @transform_3, window_bounds = array<i64: 1, 2, 128>}]} {
    %c0_i32 = arith.constant 0 : i32
    %0 = arith.cmpi eq, %arg2, %c0_i32 : i32
    %1 = arith.extui %0 : i1 to i32
    %c0_i32_0 = arith.constant 0 : i32
    %2 = arith.cmpi ne, %1, %c0_i32_0 : i32
    scf.if %2 {
      %cst_10 = arith.constant 0.000000e+00 : f32
      %12 = vector.broadcast %cst_10 : f32 to vector<128x128xf32>
      %c0_11 = arith.constant 0 : index
      %c0_12 = arith.constant 0 : index
      %13 = vector.load %arg7[%c0_11, %c0_12] : memref<128x128xf32, #tpu.memory_space<vmem>>, vector<128x128xf32>
      tpu.vector_store %arg7[%c0_11, %c0_12], %12 {strides = array<i32>} : memref<128x128xf32, #tpu.memory_space<vmem>>, vector<128x128xf32>,
    } else {
    }
    %c0 = arith.constant 0 : index
    %c0_1 = arith.constant 0 : index
    %3 = vector.load %arg7[%c0, %c0_1] : memref<128x128xf32, #tpu.memory_space<vmem>>, vector<128x128xf32>
    %c0_2 = arith.constant 0 : index
    %c0_3 = arith.constant 0 : index
    %4 = vector.load %arg3[%c0_2, %c0_3] : memref<128x128xbf16, #tpu.memory_space<vmem>>, vector<128x128xbf16>
    %c0_4 = arith.constant 0 : index
    %c0_5 = arith.constant 0 : index
    %5 = vector.load %arg4[%c0_4, %c0_5] : memref<128x128xbf16, #tpu.memory_space<vmem>>, vector<128x128xbf16>
    %cst = arith.constant dense<0.000000e+00> : vector<128x128xf32>
    %6 = tpu.matmul %4, %5, %cst {dimension_numbers = #tpu.dot_dimension_numbers<[1], [0], [0], [1], [0, 0, 1, 1], [], []>} : vector<128x128xbf16>, vector<128x128xbf16>, vector<128x128xf32> -> vector<128x128xf32>
    %7 = arith.addf %3, %6 : vector<128x128xf32>
    %c0_6 = arith.constant 0 : index
    %c0_7 = arith.constant 0 : index
    %8 = vector.load %arg7[%c0_6, %c0_7] : memref<128x128xf32, #tpu.memory_space<vmem>>, vector<128x128xf32>
    tpu.vector_store %arg7[%c0_6, %c0_7], %7 {strides = array<i32>} : memref<128x128xf32, #tpu.memory_space<vmem>>, vector<128x128xf32>,
    %c0_i32_8 = arith.constant 0 : i32
    %9 = arith.cmpi eq, %arg2, %c0_i32_8 : i32
    %10 = arith.extui %9 : i1 to i32
    %c0_i32_9 = arith.constant 0 : i32
    %11 = arith.cmpi ne, %10, %c0_i32_9 : i32
    scf.if %11 {
      %c0_10 = arith.constant 0 : index
      %c0_11 = arith.constant 0 : index
      %12 = vector.load %arg7[%c0_10, %c0_11] : memref<128x128xf32, #tpu.memory_space<vmem>>, vector<128x128xf32>
      %13 = arith.truncf %12 : vector<128x128xf32> to vector<128x128xbf16>
      %c0_12 = arith.constant 0 : index
      %c0_13 = arith.constant 0 : index
      %14 = vector.load %arg5[%c0_12, %c0_13] : memref<128x128xbf16, #tpu.memory_space<vmem>>, vector<128x128xbf16>
      tpu.vector_store %arg5[%c0_12, %c0_13], %13 {strides = array<i32>} : memref<128x128xbf16, #tpu.memory_space<vmem>>, vector<128x128xbf16>,
      %cst_14 = arith.constant dense<0.000000e+00> : vector<128xf32>
      %15 = vector.multi_reduction <add>, %12, %cst_14 [0] : vector<128x128xf32> to vector<128xf32>
      %16 = vector.shape_cast %15 : vector<128xf32> to vector<1x128xf32>
      %c0_15 = arith.constant 0 : index
      %c0_16 = arith.constant 0 : index
      %c0_17 = arith.constant 0 : index
      %17 = vector.load %arg6[%c0_15, %c0_16, %c0_17] : memref<1x2x128xf32, #tpu.memory_space<vmem>>, vector<1x1x128xf32>
      %18 = vector.shape_cast %17 : vector<1x1x128xf32> to vector<1x128xf32>
      %19 = vector.shape_cast %16 : vector<1x128xf32> to vector<1x1x128xf32>
      tpu.vector_store %arg6[%c0_15, %c0_16, %c0_17], %19 {strides = array<i32>} : memref<1x2x128xf32, #tpu.memory_space<vmem>>, vector<1x1x128xf32>,
      %20 = arith.mulf %12, %12 : vector<128x128xf32>
      %cst_18 = arith.constant dense<0.000000e+00> : vector<128xf32>
      %21 = vector.multi_reduction <add>, %20, %cst_18 [0] : vector<128x128xf32> to vector<128xf32>
      %22 = vector.shape_cast %21 : vector<128xf32> to vector<1x128xf32>
      %c0_19 = arith.constant 0 : index
      %c1 = arith.constant 1 : index
      %c0_20 = arith.constant 0 : index
      %23 = vector.load %arg6[%c0_19, %c1, %c0_20] : memref<1x2x128xf32, #tpu.memory_space<vmem>>, vector<1x1x128xf32>
      %24 = vector.shape_cast %23 : vector<1x1x128xf32> to vector<1x128xf32>
      %25 = vector.shape_cast %22 : vector<1x128xf32> to vector<1x1x128xf32>
      tpu.vector_store %arg6[%c0_19, %c1, %c0_20], %25 {strides = array<i32>} : memref<1x2x128xf32, #tpu.memory_space<vmem>>, vector<1x1x128xf32>,
    } else {
    }
    return
  }
  func.func @transform_0(%arg0: i32, %arg1: i32, %arg2: i32) -> (i32, i32) {
    %c0_i32 = arith.constant 0 : i32
    return %arg0, %arg2 : i32, i32
  }
  func.func @transform_1(%arg0: i32, %arg1: i32, %arg2: i32) -> (i32, i32) {
    %c0_i32 = arith.constant 0 : i32
    return %arg2, %arg1 : i32, i32
  }
  func.func @transform_2(%arg0: i32, %arg1: i32, %arg2: i32) -> (i32, i32) {
    %c0_i32 = arith.constant 0 : i32
    return %arg0, %arg1 : i32, i32
  }
  func.func @transform_3(%arg0: i32, %arg1: i32, %arg2: i32) -> (i32, i32, i32) {
    %c0_i32 = arith.constant 0 : i32
    %c0_i32_0 = arith.constant 0 : i32
    return %arg0, %c0_i32, %arg1 : i32, i32, i32
  }
}

</mosaic_0001>

<bundles_post_ra>
// kernel: tpu_custom_call.1
= control target key start
LH: loop header
LB: loop body
LE: loop exit
PB: predicated region body
PF: predicated region fallthrough
CT: control target
= control target key end

     0   :  { %9 = vsyncpa [#allocation4], 0  ;;  %s912_s0 = inlined_call_operand.hbm [shape: bf16[128,128], index: 0, kind: input, shape index: {}]   ;;  %s913_s1 = inlined_call_operand.hbm [shape: bf16[128,128], index: 1, kind: input, shape index: {}]   ;;  %s914_s2 = inlined_call_operand.hbm [shape: bf16[128,128], index: 2, kind: output, shape index: {0}]   ;;  %s915_s3 = inlined_call_operand.hbm [shape: f32[1,2,128], index: 3, kind: output, shape index: {1}]  }
   0x1   :  { %10 = vsyncpa [#allocation7], 0 }
   0x2   :  { %11 = vsyncpa [#allocation5], 0 }
   0x3   :  { %12 = vsyncpa [#allocation10], 0  ;;  %s805_s12 = smov [#allocation3]   ;;  %s709_s16 = scalar_lea.hbm %s912_s0, 1024 }
   0x4   :  { %s18_s13 = sshll.u32 %s805_s12, 4  ;;  %p710_p0 = scmp.ne.s32.totalorder %s912_s0, %s709_s16  ;;  %s19_s13 = int_to_ptr.vmem [resolvable:$true] %s18_s13 }
   0x5   :  { %p713_p1 = scmp.lt.u32.totalorder %s709_s16, %s912_s0 }
   0x7   :  { %p715_p2 = pnand %p713_p1, %p710_p0 }
   0x9   :  { %718 = shalt.err (!%p715_p2)
}
   0xa   :  { %s719_s21 = scalar_lea.vmem %s19_s13, 1024  ;;  %p724_p4 = scmp.lt.s32.totalorder %s19_s13, %s19_s13 }
   0xb   :  { %p720_p3 = scmp.ne.s32.totalorder %s19_s13, %s719_s21  ;;  %p725_p5 = scmp.lt.s32.totalorder %s719_s21, %s719_s21 }
   0xd   :  { %p726_p6 = por %p725_p5, %p724_p4 }
   0xf   :  { %p727_p7 = pnand %p726_p6, %p720_p3 }
  0x11   :  { %730 = shalt.err (!%p727_p7)
}
  0x12   :  { %s806_s22 = smov 64   ;;  %s807_s23 = smov 4  }
  0x13   :  { %24 = dma.hbm_to_vmem [thread:$0]  %s912_s0, 1024, %s19_s13, [#allocation4], %s806_s22, %s806_s22, %s807_s23  }
  0x14   :  { %s808_s26 = smov [#allocation6]   ;;  %s731_s30 = scalar_lea.hbm %s913_s1, 1024 }
  0x15   :  { %s30_s27 = sshll.u32 %s808_s26, 4  ;;  %p732_p8 = scmp.ne.s32.totalorder %s913_s1, %s731_s30  ;;  %s31_s27 = int_to_ptr.vmem [resolvable:$true] %s30_s27 }
  0x16   :  { %p735_p9 = scmp.lt.u32.totalorder %s731_s30, %s913_s1 }
  0x18   :  { %p737_p10 = pnand %p735_p9, %p732_p8 }
  0x1a   :  { %740 = shalt.err (!%p737_p10)
}
  0x1b   :  { %s741_s8 = scalar_lea.vmem %s31_s27, 1024  ;;  %p746_p12 = scmp.lt.s32.totalorder %s31_s27, %s31_s27 }
  0x1c   :  { %p742_p11 = scmp.ne.s32.totalorder %s31_s27, %s741_s8  ;;  %p747_p13 = scmp.lt.s32.totalorder %s741_s8, %s741_s8 }
  0x1e   :  { %p748_p0 = por %p747_p13, %p746_p12 }
  0x20   :  { %p749_p1 = pnand %p748_p0, %p742_p11 }
  0x22   :  { %752 = shalt.err (!%p749_p1)
}
  0x23   :  { %36 = dma.hbm_to_vmem [thread:$0]  %s913_s1, 1024, %s31_s27, [#allocation7], %s806_s22, %s806_s22, %s807_s23  }
  0x24   :  { %797 = dma.done.wait [#allocation4], 1024  }
  0x25   :  { %798 = vsyncadd [#allocation4], 4294966272 }
  0x26   :  { %799 = dma.done.wait [#allocation7], 1024  }
  0x27   :  { %800 = vsyncadd [#allocation7], 4294966272  ;;  %v693_v0 = vld [vmem:[#allocation6] sm:$0xff]   ;;  %v694_v1 = vld [vmem:[#allocation6 + $0x8] sm:$0xff]   ;;  %s809_s1 = smov [#allocation8]  }
  0x28   :  { %639 = vmatprep.subr.bf16.mxu0 %v693_v0  ;;  %671 = vmatprep.subr.bf16.mxu1 %v693_v0  ;;  %v695_v2 = vld [vmem:[#allocation6 + $0x10] sm:$0xff]   ;;  %v696_v3 = vld [vmem:[#allocation6 + $0x18] sm:$0xff]   ;;  %v701_v4 = vld [vmem:[#allocation3] sm:$0xff]   ;;  %s501_s10 = sshll.u32 %s809_s1, 4  ;;  %s502_s10 = int_to_ptr.vmem [resolvable:$true] %s501_s10 }
  0x29   :  { %640 = vmatpush3.bf16.msra.mxu0 %v693_v0  ;;  %679 = vmatpush3.bf16.msra.mxu1 %v693_v0  ;;  %v697_v5 = vld [vmem:[#allocation6 + $0x20] sm:$0xff]   ;;  %v698_v7 = vld [vmem:[#allocation6 + $0x28] sm:$0xff]   ;;  %v699_v8 = vld [vmem:[#allocation6 + $0x30] sm:$0xff]   ;;  %s753_s11 = scalar_lea.vmem %s502_s10, 1024  ;;  %p758_p3 = scmp.lt.s32.totalorder %s502_s10, %s502_s10 }
  0x2a   :  { %641 = vmatprep.subr.bf16.mxu0 %v694_v1  ;;  %672 = vmatprep.subr.bf16.mxu1 %v694_v1  ;;  %v705_v6 = vld [vmem:[#allocation3 + $0x20] sm:$0xff]   ;;  %v700_v9 = vld [vmem:[#allocation6 + $0x38] sm:$0xff]   ;;  %v702_v10 = vld [vmem:[#allocation3 + $0x8] sm:$0xff]   ;;  %p754_p2 = scmp.ne.s32.totalorder %s502_s10, %s753_s11  ;;  %p759_p4 = scmp.lt.s32.totalorder %s753_s11, %s753_s11 }
  0x2b   :  { %655 = vmatprep.mubr.bf16.mxu0 %v701_v4  ;;  %663 = vmatprep.mubr.bf16.mxu1 %v705_v6  ;;  %v706_v11 = vld [vmem:[#allocation3 + $0x28] sm:$0xff]   ;;  %v703_v12 = vld [vmem:[#allocation3 + $0x10] sm:$0xff]   ;;  %v704_v14 = vld [vmem:[#allocation3 + $0x18] sm:$0xff]  }
  0x2c   :  { %v707_v13 = vld [vmem:[#allocation3 + $0x30] sm:$0xff]   ;;  %v708_v15 = vld [vmem:[#allocation3 + $0x38] sm:$0xff]   ;;  %p760_p5 = por %p759_p4, %p758_p3 }
  0x2d   :  { %642 = vmatpush3.bf16.msra.mxu0 %v694_v1  ;;  %680 = vmatpush3.bf16.msra.mxu1 %v694_v1 }
  0x2e   :  { %643 = vmatprep.subr.bf16.mxu0 %v695_v2  ;;  %673 = vmatprep.subr.bf16.mxu1 %v695_v2  ;;  %p761_p6 = pnand %p760_p5, %p754_p2 }
  0x31   :  { %644 = vmatpush3.bf16.msra.mxu0 %v695_v2  ;;  %681 = vmatpush3.bf16.msra.mxu1 %v695_v2 }
  0x32   :  { %645 = vmatprep.subr.bf16.mxu0 %v696_v3  ;;  %674 = vmatprep.subr.bf16.mxu1 %v696_v3 }
  0x35   :  { %646 = vmatpush3.bf16.msra.mxu0 %v696_v3  ;;  %682 = vmatpush3.bf16.msra.mxu1 %v696_v3 }
  0x36   :  { %647 = vmatprep.subr.bf16.mxu0 %v697_v5  ;;  %675 = vmatprep.subr.bf16.mxu1 %v697_v5 }
  0x39   :  { %648 = vmatpush3.bf16.msra.mxu0 %v697_v5  ;;  %683 = vmatpush3.bf16.msra.mxu1 %v697_v5 }
  0x3a   :  { %649 = vmatprep.subr.bf16.mxu0 %v698_v7  ;;  %676 = vmatprep.subr.bf16.mxu1 %v698_v7 }
  0x3d   :  { %650 = vmatpush3.bf16.msra.mxu0 %v698_v7  ;;  %684 = vmatpush3.bf16.msra.mxu1 %v698_v7 }
  0x3e   :  { %651 = vmatprep.subr.bf16.mxu0 %v699_v8  ;;  %677 = vmatprep.subr.bf16.mxu1 %v699_v8 }
  0x41   :  { %652 = vmatpush3.bf16.msra.mxu0 %v699_v8  ;;  %685 = vmatpush3.bf16.msra.mxu1 %v699_v8 }
  0x42   :  { %653 = vmatprep.subr.bf16.mxu0 %v700_v9  ;;  %678 = vmatprep.subr.bf16.mxu1 %v700_v9 }
  0x45   :  { %654 = vmatpush3.bf16.msra.mxu0 %v700_v9  ;;  %686 = vmatpush3.bf16.msra.mxu1 %v700_v9 }
  0x48   :  { %656 = vmatmul.mubr.bf16.vlgmr.msra.gmra.mrb[0].mxu0 %v702_v10  ;;  %664 = vmatmul.mubr.bf16.vlgmr.msra.gmra.mrb[0].mxu1 %v706_v11 }
  0x49   :  { %659 = vmatprep.mubr.bf16.mxu0 %v703_v12  ;;  %667 = vmatprep.mubr.bf16.mxu1 %v707_v13 }
  0x50   :  { %660 = vmatmul.mubr.bf16.gmra.mrb[4].mxu0 %v704_v14  ;;  %668 = vmatmul.mubr.bf16.gmra.mrb[4].mxu1 %v708_v15 }
 0x11b   :  { %v657_v16 = vpop.f32.mrb[0].mxu0  ;;  %v861_v17 = vpop.f32.mrb[0].mxu1 }
 0x11c   :  { %v242_v18 = vpop.f32.mrb[1].mxu0  ;;  %v863_v19 = vpop.f32.mrb[1].mxu1  ;;  %v460_v31 = vmul.f32 %v657_v16, %v657_v16 }
 0x11d   :  { %v658_v20 = vpop.f32.mrb[2].mxu0  ;;  %v865_v21 = vpop.f32.mrb[2].mxu1  ;;  %v458_v22 = vmul.f32 %v242_v18, %v242_v18  ;;  %v466_v61 = vmul.f32 %v863_v19, %v863_v19 }
 0x11e   :  { %v584_v23 = vpack.c.bf16 %v658_v20, %v657_v16  ;;  %v245_v24 = vpop.f32.mrb[3].mxu0  ;;  %v604_v25 = vpack.c.bf16 %v865_v21, %v861_v17  ;;  %v869_v26 = vpop.f32.mrb[3].mxu1  ;;  %v461_v34 = vmul.f32 %v658_v20, %v658_v20 }
 0x11f   :  { %v579_v27 = vpack.c.bf16 %v245_v24, %v242_v18  ;;  %v436_v28 = vadd.f32 %v245_v24, %v242_v18  ;;  %v459_v29 = vmul.f32 %v245_v24, %v245_v24  ;;  %v599_v30 = vpack.c.bf16 %v869_v26, %v863_v19 }
 0x120   :  { %616 = vst [vmem:[#allocation8 + $0x8] sm:$0xff] %v584_v23   ;;  %620 = vst [vmem:[#allocation8 + $0x28] sm:$0xff] %v604_v25  }
 0x121   :  { %580 = vst [vmem:[#allocation8] sm:$0xff] %v579_v27   ;;  %v437_v32 = vadd.f32 %v657_v16, %v436_v28  ;;  %v474_v33 = vadd.f32 %v459_v29, %v458_v22  ;;  %619 = vst [vmem:[#allocation8 + $0x20] sm:$0xff] %v599_v30  }
 0x123   :  { %v475_v35 = vadd.f32 %v474_v33, %v460_v31  ;;  %v661_v36 = vpop.f32.mrb[4].mxu0  ;;  %v438_v37 = vadd.f32 %v658_v20, %v437_v32  ;;  %v669_v38 = vpop.f32.mrb[4].mxu1 }
 0x124   :  { %v258_v39 = vpop.f32.mrb[5].mxu0  ;;  %v290_v40 = vpop.f32.mrb[5].mxu1  ;;  %v464_v55 = vmul.f32 %v661_v36, %v661_v36 }
 0x125   :  { %v439_v41 = vadd.f32 %v438_v37, %v258_v39  ;;  %v462_v42 = vmul.f32 %v258_v39, %v258_v39  ;;  %v476_v43 = vadd.f32 %v475_v35, %v461_v34  ;;  %v662_v44 = vpop.f32.mrb[6].mxu0  ;;  %v670_v45 = vpop.f32.mrb[6].mxu1 }
 0x126   :  { %v594_v46 = vpack.c.bf16 %v662_v44, %v661_v36  ;;  %v261_v47 = vpop.f32.mrb[7].mxu0  ;;  %v614_v48 = vpack.c.bf16 %v670_v45, %v669_v38  ;;  %v293_v49 = vpop.f32.mrb[7].mxu1  ;;  %v465_v58 = vmul.f32 %v662_v44, %v662_v44 }
 0x127   :  { %v477_v50 = vadd.f32 %v476_v43, %v462_v42  ;;  %v589_v51 = vpack.c.bf16 %v261_v47, %v258_v39  ;;  %v440_v52 = vadd.f32 %v439_v41, %v261_v47  ;;  %v463_v53 = vmul.f32 %v261_v47, %v261_v47 }
 0x128   :  { %618 = vst [vmem:[#allocation8 + $0x18] sm:$0xff] %v594_v46   ;;  %622 = vst [vmem:[#allocation8 + $0x38] sm:$0xff] %v614_v48   ;;  %v609_v54 = vpack.c.bf16 %v293_v49, %v290_v40 }
 0x129   :  { %617 = vst [vmem:[#allocation8 + $0x10] sm:$0xff] %v589_v51   ;;  %v441_v56 = vadd.f32 %v661_v36, %v440_v52  ;;  %v478_v57 = vadd.f32 %v477_v50, %v463_v53 }
 0x12a   :  { %621 = vst [vmem:[#allocation8 + $0x30] sm:$0xff] %v609_v54  }
 0x12b   :  { %v479_v59 = vadd.f32 %v478_v57, %v464_v55  ;;  %v442_v60 = vadd.f32 %v662_v44, %v441_v56 }
 0x12c   :  { %764 = shalt.err (!%p761_p6)
}
 0x12d   :  { %s765_s14 = scalar_lea.hbm %s914_s2, 1024 }
 0x12e   :  { %p766_p7 = scmp.ne.s32.totalorder %s914_s2, %s765_s14  ;;  %p769_p8 = scmp.lt.u32.totalorder %s765_s14, %s914_s2 }
 0x130   :  { %p771_p9 = pnand %p769_p8, %p766_p7 }
 0x132   :  { %774 = shalt.err (!%p771_p9)
}
 0x133   :  { %507 = dma.vmem_to_hbm [thread:$0]  %s502_s10, 1024, %s914_s2, [#allocation5], %s806_s22, %s806_s22, %s807_s23   ;;  %v443_v62 = vadd.f32 %v442_v60, %v863_v19  ;;  %v480_v63 = vadd.f32 %v479_v59, %v465_v58  ;;  %v467_v2 = vmul.f32 %v869_v26, %v869_v26  ;;  %v468_v3 = vmul.f32 %v861_v17, %v861_v17 }
 0x134   :  { %v469_v6 = vmul.f32 %v865_v21, %v865_v21  ;;  %v470_v9 = vmul.f32 %v290_v40, %v290_v40  ;;  %v471_v14 = vmul.f32 %v293_v49, %v293_v49  ;;  %v472_v15 = vmul.f32 %v669_v38, %v669_v38  ;;  %s810_s2 = smov [#allocation9]  }
 0x135   :  { %v481_v0 = vadd.f32 %v480_v63, %v466_v61  ;;  %v444_v1 = vadd.f32 %v443_v62, %v869_v26  ;;  %v473_v19 = vmul.f32 %v670_v45, %v670_v45  ;;  %s514_s21 = sshll.u32 %s810_s2, 4  ;;  %s515_s21 = int_to_ptr.vmem [resolvable:$true] %s514_s21 }
 0x136   :  { %s775_s22 = scalar_lea.vmem %s515_s21, 32  ;;  %p780_p11 = scmp.lt.s32.totalorder %s515_s21, %s515_s21 }
 0x137   :  { %v445_v4 = vadd.f32 %v861_v17, %v444_v1  ;;  %v482_v5 = vadd.f32 %v481_v0, %v467_v2  ;;  %p776_p10 = scmp.ne.s32.totalorder %s515_s21, %s775_s22  ;;  %p781_p12 = scmp.lt.s32.totalorder %s775_s22, %s775_s22 }
 0x139   :  { %v483_v7 = vadd.f32 %v482_v5, %v468_v3  ;;  %v446_v8 = vadd.f32 %v865_v21, %v445_v4  ;;  %p782_p13 = por %p781_p12, %p780_p11 }
 0x13b   :  { %v447_v10 = vadd.f32 %v446_v8, %v290_v40  ;;  %v484_v11 = vadd.f32 %v483_v7, %v469_v6  ;;  %p783_p0 = pnand %p782_p13, %p776_p10 }
 0x13d   :  { %v485_v12 = vadd.f32 %v484_v11, %v470_v9  ;;  %v448_v13 = vadd.f32 %v447_v10, %v293_v49 }
 0x13f   :  { %v449_v16 = vadd.f32 %v669_v38, %v448_v13  ;;  %v486_v18 = vadd.f32 %v485_v12, %v471_v14 }
 0x141   :  { %v450_v20 = vadd.f32 %v670_v45, %v449_v16  ;;  %v487_v22 = vadd.f32 %v486_v18, %v472_v15 }
 0x143   :  { %v451_v17 = vrot.slane %v450_v20, 4  ;;  %v488_v23 = vadd.f32 %v487_v22, %v473_v19 }
 0x145   :  { %v452_v24 = vadd.f32 %v451_v17, %v450_v20  ;;  %v489_v25 = vrot.slane %v488_v23, 4 }
 0x147   :  { %v453_v26 = vrot.slane %v452_v24, 2  ;;  %v490_v27 = vadd.f32 %v489_v25, %v488_v23 }
 0x149   :  { %v454_v28 = vadd.f32 %v453_v26, %v452_v24  ;;  %v491_v21 = vrot.slane %v490_v27, 2 }
 0x14b   :  { %v455_v29 = vrot.slane %v454_v28, 1  ;;  %v492_v30 = vadd.f32 %v491_v21, %v490_v27 }
 0x14d   :  { %v456_v31 = vadd.f32 %v455_v29, %v454_v28  ;;  %v493_v32 = vrot.slane %v492_v30, 1 }
 0x14f   :  { %457 = vst [vmem:[#allocation9] sm:$0x1] %v456_v31  ;;  %v494_v33 = vadd.f32 %v493_v32, %v492_v30 }
 0x151   :  { %495 = vst [vmem:[#allocation9 + $0x1] sm:$0x1] %v494_v33 }
 0x152   :  { %786 = shalt.err (!%p783_p0)
}
 0x153   :  { %s787_s25 = scalar_lea.hbm %s915_s3, 32 }
 0x154   :  { %p788_p1 = scmp.ne.s32.totalorder %s915_s3, %s787_s25  ;;  %p791_p2 = scmp.lt.u32.totalorder %s787_s25, %s915_s3 }
 0x156   :  { %p793_p3 = pnand %p791_p2, %p788_p1 }
 0x158   :  { %796 = shalt.err (!%p793_p3)
}
 0x159   :  { %517 = dma.vmem_to_hbm [thread:$0]  %s515_s21, 32, %s915_s3, [#allocation10]  }
 0x15a   :  { %801 = dma.done.wait [#allocation5], 1024  }
 0x15b   :  { %802 = vsyncadd [#allocation5], 4294966272 }
 0x15c   :  { %803 = dma.done.wait [#allocation10], 32  }
 0x15d   :  { %804 = vsyncadd [#allocation10], 4294967264 }
 0x15e   :  { %524 = vsyncpa [#allocation4], 1 }
 0x15f   :  { %525 = vsyncpa [#allocation7], 1 }
 0x160   :  { %526 = vsyncpa [#allocation5], 1 }
 0x161   :  { %527 = vsyncpa [#allocation10], 1 }

</bundles_post_ra>
